<compile_context>
chip_gen: v7x
topology: tpu7x:2x2x1
jax: 0.10.0
libtpu: 0.0.40
codegen_flags: <defaults>
</compile_context>

<pallas_src>
import jax
import jax.numpy as jnp
from jax.experimental import pallas as pl
from jax.experimental.pallas import tpu as pltpu


def _qnet_kernel(xt_ref, w1_ref, b1_ref, w2_ref, b2_ref, w3_ref, b3_ref, out_ref):
    """Fused 3-layer MLP forward on one (S, TB) transposed batch tile.

    Ref shapes (all f32, all VMEM-resident, batch on the lane axis):
      xt_ref  : (S, TB)   x^T tile
      w1_ref  : (S, S)    linear[0].weight  (PyTorch (out, in) layout)
      b1_ref  : (S, 1)
      w2_ref  : (H, S)    linear[2].weight  (H = (S + A) // 2)
      b2_ref  : (H, 1)
      w3_ref  : (A, H)    linear[4].weight
      b3_ref  : (A, 1)
      out_ref : (A, TB)   q^T tile
    """
    xt = xt_ref[...]
    h1 = jnp.maximum(
        jnp.dot(w1_ref[...], xt, preferred_element_type=jnp.float32) + b1_ref[...],
        0.0)
    h2 = jnp.maximum(
        jnp.dot(w2_ref[...], h1, preferred_element_type=jnp.float32) + b2_ref[...],
        0.0)
    out_ref[...] = (
        jnp.dot(w3_ref[...], h2, preferred_element_type=jnp.float32) + b3_ref[...])


def _round_up(n, m):
    return ((n + m - 1) // m) * m


@jax.jit
def qnetwork_forward(x, params):
    """Pallas-backed forward pass of QNetwork.

    x: (B, state_size) or (state_size,). params: dict from init_params (weights in
    PyTorch (out, in) layout, biases as (out, 1) columns). Returns (B, action_size)
    (or (action_size,) unbatched), matching `self.linear(x)` of the PyTorch module.
    """
    squeeze = (x.ndim == 1)
    if squeeze:
        x = x[None, :]
    x = x.astype(jnp.float32)
    B, S = x.shape
    H = params["w2"].shape[0]
    A = params["w3"].shape[0]

    # Batch tile on the lane axis: whole batch in one lane-aligned block when small,
    # >= 4 tiles (v7x megacore gets >= 2 per core) capped at 4096 rows when large.
    LANE = 128
    if B <= 512:
        TB = _round_up(B, LANE)
    else:
        TB = min(4096, _round_up(pl.cdiv(B, 4), LANE))
    Bp = _round_up(B, TB)

    # Single per-call layout op: batch-in-lanes x^T (the lane pad fuses with it).
    xt = x.T
    if Bp != B:
        xt = jnp.pad(xt, ((0, 0), (0, Bp - B)))

    out_t = pl.pallas_call(
        _qnet_kernel,
        out_shape=jax.ShapeDtypeStruct((A, Bp), jnp.float32),
        grid=(Bp // TB,),
        in_specs=[
            pl.BlockSpec((S, TB), lambda i: (0, i)),   # x^T tile
            pl.BlockSpec((S, S), lambda i: (0, 0)),    # W1 (resident, not re-DMA'd)
            pl.BlockSpec((S, 1), lambda i: (0, 0)),    # b1
            pl.BlockSpec((H, S), lambda i: (0, 0)),    # W2
            pl.BlockSpec((H, 1), lambda i: (0, 0)),    # b2
            pl.BlockSpec((A, H), lambda i: (0, 0)),    # W3
            pl.BlockSpec((A, 1), lambda i: (0, 0)),    # b3
        ],
        out_specs=pl.BlockSpec((A, TB), lambda i: (0, i)),
        compiler_params=pltpu.CompilerParams(
            dimension_semantics=("parallel",)),
    )(xt, params["w1"], params["b1"], params["w2"], params["b2"],
      params["w3"], params["b3"])

    q = out_t[:, :B].T     # tiny (A, B) transpose back to batch-major
    return q[0] if squeeze else q


def _reference_forward(x, params):
    """Pure-JAX reference of the PyTorch nn.Sequential forward."""
    h1 = jnp.maximum(x @ params["w1"].T + params["b1"][:, 0], 0.0)
    h2 = jnp.maximum(h1 @ params["w2"].T + params["b2"][:, 0], 0.0)
    return h2 @ params["w3"].T + params["b3"][:, 0]


def init_params(key, state_size, action_size):
    """PyTorch-style uniform(-1/sqrt(fan_in), +1/sqrt(fan_in)) init, stored directly in
    the kernel-native layout (weights (out, in), biases (out, 1)) so the forward path
    has zero per-call transposes/reshapes of the parameters."""
    # TODO(synk): Adam optimizer, MSELoss and .to(device) are training/host concerns
    # with no forward-pass kernel equivalent; only forward() is implemented.
    S, A = state_size, action_size
    H = (S + A) // 2
    ks = jax.random.split(key, 6)
    u = lambda kk, shape, fan_in: jax.random.uniform(
        kk, shape, jnp.float32,
        -1.0 / jnp.sqrt(jnp.float32(fan_in)), 1.0 / jnp.sqrt(jnp.float32(fan_in)))
    return {
        "w1": u(ks[0], (S, S), S),     # nn.Linear(state_size, state_size).weight
        "b1": u(ks[1], (S, 1), S),
        "w2": u(ks[2], (H, S), S),     # nn.Linear(state_size, (S + A) // 2).weight
        "b2": u(ks[3], (H, 1), S),
        "w3": u(ks[4], (A, H), H),     # nn.Linear((S + A) // 2, action_size).weight
        "b3": u(ks[5], (A, 1), H),
    }


if __name__ == "__main__":
    state_size = 32
    action_size = 16
    batch = 8

    key = jax.random.PRNGKey(0)
    k_param, k_x = jax.random.split(key)
    params = init_params(k_param, state_size, action_size)
    x = jax.random.normal(k_x, (batch, state_size), jnp.float32)

    q = qnetwork_forward(x, params)
    jax.block_until_ready(q)

    q_ref = _reference_forward(x, params)
    assert q.shape == (batch, action_size)
    assert jnp.allclose(q, q_ref, atol=1e-3, rtol=1e-3), (
        float(jnp.max(jnp.abs(q - q_ref))))

    print("KERNEL_OK")
</pallas_src>

<mosaic_0001>
module attributes {stable_mosaic.version = 11 : i64} {
  func.func @_qnet_kernel(%arg0: i32, %arg1: memref<32x128xf32, #tpu.memory_space<vmem>>, %arg2: memref<32x32xf32, #tpu.memory_space<vmem>>, %arg3: memref<32x1xf32, #tpu.memory_space<vmem>>, %arg4: memref<24x32xf32, #tpu.memory_space<vmem>>, %arg5: memref<24x1xf32, #tpu.memory_space<vmem>>, %arg6: memref<16x24xf32, #tpu.memory_space<vmem>>, %arg7: memref<16x1xf32, #tpu.memory_space<vmem>>, %arg8: memref<16x128xf32, #tpu.memory_space<vmem>>) attributes {dimension_semantics = [#tpu.dimension_semantics<parallel>], iteration_bounds = array<i64: 1>, scalar_prefetch = 0 : i64, scratch_operands = 0 : i64, tpu.core_type = #tpu.core_type<tc>, window_params = [{transform_indices = @transform_0, window_bounds = array<i64: 32, 128>}, {pipeline_mode = #tpu.pipeline_mode<synchronous>, transform_indices = @transform_1, window_bounds = array<i64: 32, 32>}, {pipeline_mode = #tpu.pipeline_mode<synchronous>, transform_indices = @transform_2, window_bounds = array<i64: 32, 1>}, {pipeline_mode = #tpu.pipeline_mode<synchronous>, transform_indices = @transform_3, window_bounds = array<i64: 24, 32>}, {pipeline_mode = #tpu.pipeline_mode<synchronous>, transform_indices = @transform_4, window_bounds = array<i64: 24, 1>}, {pipeline_mode = #tpu.pipeline_mode<synchronous>, transform_indices = @transform_5, window_bounds = array<i64: 16, 24>}, {pipeline_mode = #tpu.pipeline_mode<synchronous>, transform_indices = @transform_6, window_bounds = array<i64: 16, 1>}, {transform_indices = @transform_7, window_bounds = array<i64: 16, 128>}]} {
    %c0 = arith.constant 0 : index
    %c0_0 = arith.constant 0 : index
    %0 = vector.load %arg1[%c0, %c0_0] : memref<32x128xf32, #tpu.memory_space<vmem>>, vector<32x128xf32>
    %c0_1 = arith.constant 0 : index
    %c0_2 = arith.constant 0 : index
    %1 = vector.load %arg2[%c0_1, %c0_2] : memref<32x32xf32, #tpu.memory_space<vmem>>, vector<32x32xf32>
    %cst = arith.constant dense<0.000000e+00> : vector<32x128xf32>
    %2 = tpu.matmul %1, %0, %cst {dimension_numbers = #tpu.dot_dimension_numbers<[1], [0], [0], [1], [0, 0, 1, 1], [], []>} : vector<32x32xf32>, vector<32x128xf32>, vector<32x128xf32> -> vector<32x128xf32>
    %c0_3 = arith.constant 0 : index
    %c0_4 = arith.constant 0 : index
    %3 = vector.load %arg3[%c0_3, %c0_4] : memref<32x1xf32, #tpu.memory_space<vmem>>, vector<32x1xf32>
    %4 = vector.broadcast %3 : vector<32x1xf32> to vector<32x128xf32>
    %5 = arith.addf %2, %4 : vector<32x128xf32>
    %cst_5 = arith.constant 0.000000e+00 : f32
    %6 = vector.broadcast %cst_5 : f32 to vector<32x128xf32>
    %7 = arith.maximumf %5, %6 : vector<32x128xf32>
    %c0_6 = arith.constant 0 : index
    %c0_7 = arith.constant 0 : index
    %8 = vector.load %arg4[%c0_6, %c0_7] : memref<24x32xf32, #tpu.memory_space<vmem>>, vector<24x32xf32>
    %cst_8 = arith.constant dense<0.000000e+00> : vector<24x128xf32>
    %9 = tpu.matmul %8, %7, %cst_8 {dimension_numbers = #tpu.dot_dimension_numbers<[1], [0], [0], [1], [0, 0, 1, 1], [], []>} : vector<24x32xf32>, vector<32x128xf32>, vector<24x128xf32> -> vector<24x128xf32>
    %c0_9 = arith.constant 0 : index
    %c0_10 = arith.constant 0 : index
    %10 = vector.load %arg5[%c0_9, %c0_10] : memref<24x1xf32, #tpu.memory_space<vmem>>, vector<24x1xf32>
    %11 = vector.broadcast %10 : vector<24x1xf32> to vector<24x128xf32>
    %12 = arith.addf %9, %11 : vector<24x128xf32>
    %cst_11 = arith.constant 0.000000e+00 : f32
    %13 = vector.broadcast %cst_11 : f32 to vector<24x128xf32>
    %14 = arith.maximumf %12, %13 : vector<24x128xf32>
    %c0_12 = arith.constant 0 : index
    %c0_13 = arith.constant 0 : index
    %15 = vector.load %arg6[%c0_12, %c0_13] : memref<16x24xf32, #tpu.memory_space<vmem>>, vector<16x24xf32>
    %cst_14 = arith.constant dense<0.000000e+00> : vector<16x128xf32>
    %16 = tpu.matmul %15, %14, %cst_14 {dimension_numbers = #tpu.dot_dimension_numbers<[1], [0], [0], [1], [0, 0, 1, 1], [], []>} : vector<16x24xf32>, vector<24x128xf32>, vector<16x128xf32> -> vector<16x128xf32>
    %c0_15 = arith.constant 0 : index
    %c0_16 = arith.constant 0 : index
    %17 = vector.load %arg7[%c0_15, %c0_16] : memref<16x1xf32, #tpu.memory_space<vmem>>, vector<16x1xf32>
    %18 = vector.broadcast %17 : vector<16x1xf32> to vector<16x128xf32>
    %19 = arith.addf %16, %18 : vector<16x128xf32>
    %c0_17 = arith.constant 0 : index
    %c0_18 = arith.constant 0 : index
    %20 = vector.load %arg8[%c0_17, %c0_18] : memref<16x128xf32, #tpu.memory_space<vmem>>, vector<16x128xf32>
    tpu.vector_store %arg8[%c0_17, %c0_18], %19 {strides = array<i32>} : memref<16x128xf32, #tpu.memory_space<vmem>>, vector<16x128xf32>,
    return
  }
  func.func @transform_0(%arg0: i32) -> (i32, i32) {
    %c0_i32 = arith.constant 0 : i32
    %c0_i32_0 = arith.constant 0 : i32
    return %c0_i32, %arg0 : i32, i32
  }
  func.func @transform_1(%arg0: i32) -> (i32, i32) {
    %c0_i32 = arith.constant 0 : i32
    %c0_i32_0 = arith.constant 0 : i32
    %c0_i32_1 = arith.constant 0 : i32
    return %c0_i32, %c0_i32_0 : i32, i32
  }
  func.func @transform_2(%arg0: i32) -> (i32, i32) {
    %c0_i32 = arith.constant 0 : i32
    %c0_i32_0 = arith.constant 0 : i32
    %c0_i32_1 = arith.constant 0 : i32
    return %c0_i32, %c0_i32_0 : i32, i32
  }
  func.func @transform_3(%arg0: i32) -> (i32, i32) {
    %c0_i32 = arith.constant 0 : i32
    %c0_i32_0 = arith.constant 0 : i32
    %c0_i32_1 = arith.constant 0 : i32
    return %c0_i32, %c0_i32_0 : i32, i32
  }
  func.func @transform_4(%arg0: i32) -> (i32, i32) {
    %c0_i32 = arith.constant 0 : i32
    %c0_i32_0 = arith.constant 0 : i32
    %c0_i32_1 = arith.constant 0 : i32
    return %c0_i32, %c0_i32_0 : i32, i32
  }
  func.func @transform_5(%arg0: i32) -> (i32, i32) {
    %c0_i32 = arith.constant 0 : i32
    %c0_i32_0 = arith.constant 0 : i32
    %c0_i32_1 = arith.constant 0 : i32
    return %c0_i32, %c0_i32_0 : i32, i32
  }
  func.func @transform_6(%arg0: i32) -> (i32, i32) {
    %c0_i32 = arith.constant 0 : i32
    %c0_i32_0 = arith.constant 0 : i32
    %c0_i32_1 = arith.constant 0 : i32
    return %c0_i32, %c0_i32_0 : i32, i32
  }
  func.func @transform_7(%arg0: i32) -> (i32, i32) {
    %c0_i32 = arith.constant 0 : i32
    %c0_i32_0 = arith.constant 0 : i32
    return %c0_i32, %arg0 : i32, i32
  }
}

</mosaic_0001>

<bundles_post_ra>
// kernel: qnetwork_forward.1
= control target key start
LH: loop header
LB: loop body
LE: loop exit
PB: predicated region body
PF: predicated region fallthrough
CT: control target
= control target key end

     0   :  { %vm58_vm0 = vcmask 261120   ;;  %v468_v3 = vmov 0   ;;  %v469_v20 = vmov 0.0|0.0   ;;  %vm470_vm1 = vmmov 0   ;;  %s596_s0 = inlined_call_operand.vmem [shape: f32[32,128], index: 0, kind: input, shape index: {}]   ;;  %s597_s1 = inlined_call_operand.vmem [shape: f32[32,32], index: 1, kind: input, shape index: {}]   ;;  %s598_s2 = inlined_call_operand.vmem [shape: f32[32,1], index: 2, kind: input, shape index: {}]   ;;  %s599_s4 = inlined_call_operand.vmem [shape: f32[24,1], index: 4, kind: input, shape index: {}]   ;;  %s600_s6 = inlined_call_operand.vmem [shape: f32[16,1], index: 6, kind: input, shape index: {}]   ;;  %s601_s3 = inlined_call_operand.vmem [shape: f32[24,32], index: 3, kind: input, shape index: {}]   ;;  %s602_s5 = inlined_call_operand.vmem [shape: f32[16,24], index: 5, kind: input, shape index: {}]   ;;  %s603_s7 = inlined_call_operand.vmem [shape: f32[16,128], index: 7, kind: output, shape index: {}]  }
   0x1   :  { %v26_v0 = vld [vmem:[%s596_s0] sm:$0xff]  ;;  %v27_v1 = vld [vmem:[%s596_s0 + $0x8] sm:$0xff]  ;;  %v28_v2 = vld [vmem:[%s596_s0 + $0x10] sm:$0xff]  ;;  %466 = vset.pattern.permute.xlu0 %v468_v3  ;;  %467 = vset.pattern.permute.xlu1 %v468_v3  ;;  %v471_v21 = vmov 0.0   ;;  %vm287_vm2 = vcmask 195584  }
   0x2   :  { %v444_v4 = vpack.c.bf16 %v27_v1, %v26_v0  ;;  %v29_v5 = vld [vmem:[%s596_s0 + $0x18] sm:$0xff]  ;;  %v30_v6 = vld [vmem:[%s597_s1] sm:$0xff]  ;;  %v36_v9 = vld [vmem:[%s598_s2 + $0x10] sm:$0xff]  ;;  %452 = vmatprep.subr.bf16.mxu1 %v469_v20  ;;  %426 = vmatprep.mubr.msk.f32.mxu1 %vm470_vm1, %v471_v21 }
   0x3   :  { %v448_v7 = vpack.c.bf16 %v29_v5, %v28_v2  ;;  %412 = vmatprep.mubr.msk.f32.mxu0 %vm58_vm0, %v30_v6  ;;  %v34_v8 = vld [vmem:[%s598_s2] sm:$0xff]  ;;  %v35_v10 = vld [vmem:[%s598_s2 + $0x8] sm:$0xff]  ;;  %50 = vperm.xlu1 %467, %v36_v9   ;;  %v37_v11 = vld [vmem:[%s598_s2 + $0x18] sm:$0xff] }
   0x4   :  { %445 = vmatprep.subr.bf16.mxu0 %v444_v4  ;;  %40 = vperm.xlu0 %466, %v34_v8   ;;  %v31_v12 = vld [vmem:[%s597_s1 + $0x8] sm:$0xff]  ;;  %v163_v13 = vld [vmem:[%s599_s4] sm:$0xff]  ;;  %v32_v14 = vld [vmem:[%s597_s1 + $0x10] sm:$0xff] }
   0x5   :  { %447 = vmatpush3.bf16.msra.mxu0 %v444_v4  ;;  %v164_v15 = vld [vmem:[%s599_s4 + $0x8] sm:$0xff]  ;;  %v33_v16 = vld [vmem:[%s597_s1 + $0x18] sm:$0xff]  ;;  %v165_v17 = vld [vmem:[%s599_s4 + $0x10] sm:$0xff] }
   0x6   :  { %449 = vmatprep.subr.bf16.mxu0 %v448_v7  ;;  %v275_v18 = vld [vmem:[%s600_s6] sm:$0xff]  ;;  %v276_v19 = vld [vmem:[%s600_s6 + $0x8] sm:$0xff]  ;;  %v162_v42 = vld [vmem:[%s601_s3 + $0x10] sm:$0xff] }
   0x7   :  { %55 = vperm.xlu1 %467, %v37_v11   ;;  %v160_v40 = vld [vmem:[%s601_s3] sm:$0xff]  ;;  %v161_v41 = vld [vmem:[%s601_s3 + $0x8] sm:$0xff] }
   0x8   :  { %45 = vperm.xlu0 %466, %v35_v10   ;;  %v273_v43 = vld [vmem:[%s602_s5] sm:$0xff]  ;;  %v274_v60 = vld [vmem:[%s602_s5 + $0x8] sm:$0xff] }
   0x9   :  { %451 = vmatpush3.bf16.msra.mxu0 %v448_v7 }
   0xb   :  { %173 = vperm.xlu1 %467, %v164_v15  }
   0xc   :  { %413 = vmatmul.mubr.msk.f32.vlgmr.msra.gmra.mrb[0].mxu0 %vm58_vm0, %v31_v12  ;;  %168 = vperm.xlu0 %466, %v163_v13  }
   0xd   :  { %415 = vmatprep.mubr.msk.f32.mxu0 %vm58_vm0, %v32_v14 }
   0xf   :  { %279 = vperm.xlu1 %467, %v275_v18  }
  0x10   :  { %416 = vmatmul.mubr.msk.f32.gmra.mrb[2].mxu0 %vm58_vm0, %v33_v16  ;;  %178 = vperm.xlu0 %466, %v165_v17  }
  0x11   :  { %441 = vmatprep.mubr.msk.f32.mxu0 %vm287_vm2, %v273_v43 }
  0x14   :  { %284 = vperm.xlu0 %466, %v276_v19  }
  0x82   :  { %v51_v23 = vpop.permute.xlu1 %50 }
  0x83   :  { %v41_v22 = vpop.permute.xlu0 %40 }
  0x86   :  { %v56_v30 = vpop.permute.xlu1 %55 }
  0x87   :  { %v46_v24 = vpop.permute.xlu0 %45 }
  0x8a   :  { %v174_v48 = vpop.permute.xlu1 %173 }
  0x8b   :  { %v169_v46 = vpop.permute.xlu0 %168 }
  0x8e   :  { %v280_v63 = vpop.permute.xlu1 %279 }
  0x8f   :  { %v179_v54 = vpop.permute.xlu0 %178 }
  0x93   :  { %v285_v61 = vpop.permute.xlu0 %284 }
  0xdf   :  { %v414_v25 = vpop.f32.mrb[0].mxu0 }
  0xe0   :  { %v143_v26 = vadd.f32 %v414_v25, %v46_v24  ;;  %v137_v27 = vpop.f32.mrb[1].mxu0 }
  0xe1   :  { %v138_v28 = vadd.f32 %v137_v27, %v41_v22 }
  0xe2   :  { %v157_v29 = vmax.f32 %v143_v26, 0.0 }
  0xe3   :  { %v156_v31 = vmax.f32 %v138_v28, 0.0  ;;  %v417_v32 = vpop.f32.mrb[2].mxu0 }
  0xe4   :  { %v153_v33 = vadd.f32 %v417_v32, %v56_v30  ;;  %v147_v34 = vpop.f32.mrb[3].mxu0 }
  0xe5   :  { %v148_v35 = vadd.f32 %v147_v34, %v51_v23  ;;  %v453_v36 = vpack.c.bf16 %v157_v29, %v156_v31 }
  0xe6   :  { %v159_v37 = vmax.f32 %v153_v33, 0.0 }
  0xe7   :  { %v158_v38 = vmax.f32 %v148_v35, 0.0  ;;  %454 = vmatpush3.bf16.msra.mxu1 %v453_v36 }
  0xe8   :  { %455 = vmatprep.subr.bf16.mxu1 %v469_v20 }
  0xe9   :  { %v456_v39 = vpack.c.bf16 %v159_v37, %v158_v38 }
  0xeb   :  { %457 = vmatpush3.bf16.msra.mxu1 %v456_v39 }
  0xee   :  { %427 = vmatmul.mubr.msk.f32.vlgmr.msra.gmra.mrb[0].mxu1 %vm58_vm0, %v160_v40 }
  0xef   :  { %429 = vmatprep.mubr.msk.f32.mxu1 %vm470_vm1, %v471_v21 }
  0xf2   :  { %430 = vmatmul.mubr.msk.f32.gmra.mrb[2].mxu1 %vm58_vm0, %v161_v41 }
  0xf3   :  { %432 = vmatprep.mubr.msk.f32.mxu1 %vm470_vm1, %v471_v21 }
  0xf6   :  { %433 = vmatmul.mubr.msk.f32.gmra.mrb[4].mxu1 %vm58_vm0, %v162_v42 }
 0x1c1   :  { %v256_v44 = vpop.f32.mrb[0].mxu1 }
 0x1c2   :  { %v428_v45 = vpop.f32.mrb[1].mxu1  ;;  %v257_v47 = vadd.f32 %v256_v44, %v169_v46 }
 0x1c4   :  { %v270_v52 = vmax.f32 %v257_v47, 0.0 }
 0x1c5   :  { %v261_v49 = vpop.f32.mrb[2].mxu1 }
 0x1c6   :  { %v262_v50 = vadd.f32 %v261_v49, %v174_v48  ;;  %v431_v51 = vpop.f32.mrb[3].mxu1 }
 0x1c8   :  { %v271_v53 = vmax.f32 %v262_v50, 0.0 }
 0x1c9   :  { %v266_v55 = vpop.f32.mrb[4].mxu1 }
 0x1ca   :  { %v458_v56 = vpack.c.bf16 %v271_v53, %v270_v52  ;;  %v267_v57 = vadd.f32 %v266_v55, %v179_v54  ;;  %v434_v58 = vpop.f32.mrb[5].mxu1 }
 0x1cc   :  { %v272_v59 = vmax.f32 %v267_v57, 0.0  ;;  %459 = vmatprep.subr.bf16.mxu0 %v458_v56 }
 0x1cd   :  { %461 = vmatpush3.bf16.msra.mxu0 %v458_v56 }
 0x1ce   :  { %439 = vmatprep.subr.mxu0 %v272_v59 }
 0x1d1   :  { %440 = vmatpush3.msra.mxu0 %v272_v59 }
 0x1d2   :  { %442 = vmatmul.mubr.msk.f32.vlgmr.msra.gmra.mrb[4].mxu0 %vm287_vm2, %v274_v60 }
 0x2a5   :  { %v443_v62 = vpop.f32.mrb[4].mxu0 }
 0x2a6   :  { %v366_v0 = vadd.f32 %v443_v62, %v285_v61  ;;  %v360_v1 = vpop.f32.mrb[5].mxu0 }
 0x2a7   :  { %v361_v2 = vadd.f32 %v360_v1, %v280_v63 }
 0x2a8   :  { %370 = vst [vmem:[%s603_s7 + $0x8] sm:$0xff] %v366_v0 }
 0x2a9   :  { %369 = vst [vmem:[%s603_s7] sm:$0xff] %v361_v2 }

</bundles_post_ra>
